<compile_context>
chip_gen: v7x
topology: tpu7x:2x2x1
jax: 0.10.0
libtpu: 0.0.40
codegen_flags: <defaults>
</compile_context>

<pallas_src>
import jax
import jax.numpy as jnp
from jax.experimental import pallas as pl
from jax.experimental.pallas import tpu as pltpu


def _patch_sample_kernel(x_ref, w1t_ref, b1_ref, w2t_ref, b2_ref, o_ref):
    # x_ref:   (1, C, thw)   spatial tile (lane axis = spatial positions)
    # w1t_ref: (nc, C)       first Linear weight, transposed (out x in)
    # b1_ref:  (nc, 1)
    # w2t_ref: (nc, nc)      second Linear weight, transposed
    # b2_ref:  (nc, 1)
    # o_ref:   (1, nc, thw)
    x = x_ref[0]                                                      # (C, thw)

    # Linear(C -> nc) + ReLU, column form: h = W1^T @ x + b1
    # TODO(synk): matmul uses default TPU precision (f32 accumulate); pin
    # precision=HIGHEST if bit-closer parity with PyTorch f32 GEMM is required.
    h = jnp.dot(w1t_ref[...], x, preferred_element_type=jnp.float32) + b1_ref[...]
    h = jnp.maximum(h, 0.0)

    # Linear(nc -> nc): y = W2^T @ h + b2
    y = jnp.dot(w2t_ref[...], h, preferred_element_type=jnp.float32) + b2_ref[...]

    # L2 normalize over channels (power=2): y / (||y||_2 + 1e-7), fused as a
    # single EUP rsqrt (eps folded inside the sqrt; diff ~eps/||y|| << 2e-3 tol).
    sumsq = jnp.sum(y * y, axis=0, keepdims=True)                     # (1, thw)
    inv = jax.lax.rsqrt(sumsq + 1e-14)
    o_ref[0] = (y * inv).astype(o_ref.dtype)


def _choose_spatial_tile(B, C, nc, HW, out_itemsize, vmem_budget_bytes):
    """Lane-dense spatial tile: multiple of 128 (or the full extent if HW<128).

    Sized from a byte budget covering double-buffered x/out blocks plus the
    in-kernel intermediates (h, y, y*y), so it also fits v7x's 64 MiB VMEM.
    Never exceeds the lane-floored spatial extent, so no host-side padding is
    needed (the ragged last tile is handled by the pipeline's masked stores).
    """
    lane = 128
    if HW <= lane:
        return HW                                   # full-extent block (allowed)

    per_col = 2 * C * 4 + 2 * nc * out_itemsize + 3 * nc * 4
    cap = max(lane, (vmem_budget_bytes // per_col) // lane * lane)
    hw_floor = (HW // lane) * lane                  # multiple of 128, <= HW
    thw = min(cap, 32768, hw_floor)

    # v7x megacore: prefer an even (>=2) total grid-step count for tiny grids.
    def steps(t):
        return B * ((HW + t - 1) // t)

    if (steps(thw) < 2 or (steps(thw) % 2 == 1 and steps(thw) < 8)) and thw >= 2 * lane:
        half = (thw // 2) // lane * lane
        if half >= lane:
            thw = half
    return thw


def patch_sample_mlp(x, w1, b1, w2, b2, *, out_dtype=jnp.float32,
                     vmem_budget_bytes=20 << 20):
    """x: (B, C, HW) f32.  Returns (B, nc, HW) L2-normalized MLP output.

    out_dtype=jnp.bfloat16 halves the (dominant) store traffic if downstream allows.
    """
    B, C, HW = x.shape
    nc = w1.shape[1]
    out_itemsize = jnp.dtype(out_dtype).itemsize

    thw = _choose_spatial_tile(B, C, nc, HW, out_itemsize, vmem_budget_bytes)
    n_s = pl.cdiv(HW, thw)

    w1t = jnp.transpose(w1)              # (nc, C)
    w2t = jnp.transpose(w2)              # (nc, nc)
    b1c = jnp.reshape(b1, (nc, 1))
    b2c = jnp.reshape(b2, (nc, 1))

    # Explicit VMEM limit: pipelined blocks + intermediates + weights + headroom,
    # kept well under v7x's 64 MiB physical VMEM.
    per_col = 2 * C * 4 + 2 * nc * out_itemsize + 3 * nc * 4
    used = per_col * thw + 8 * (C * nc + nc * nc + 2 * nc)
    vmem_limit = int(min(max(used + (8 << 20), 16 << 20), 48 << 20))

    return pl.pallas_call(
        _patch_sample_kernel,
        out_shape=jax.ShapeDtypeStruct((B, nc, HW), out_dtype),
        grid_spec=pltpu.PrefetchScalarGridSpec(
            num_scalar_prefetch=0,
            grid=(B, n_s),
            in_specs=[
                pl.BlockSpec((1, C, thw), lambda b, s: (b, 0, s)),
                pl.BlockSpec((nc, C), lambda b, s: (0, 0)),
                pl.BlockSpec((nc, 1), lambda b, s: (0, 0)),
                pl.BlockSpec((nc, nc), lambda b, s: (0, 0)),
                pl.BlockSpec((nc, 1), lambda b, s: (0, 0)),
            ],
            out_specs=pl.BlockSpec((1, nc, thw), lambda b, s: (b, 0, s)),
        ),
        compiler_params=pltpu.CompilerParams(
            dimension_semantics=("parallel", "parallel"),
            vmem_limit_bytes=vmem_limit,
        ),
    )(x, w1t, b1c, w2t, b2c)


class PatchSampleF:
    """JAX/Pallas port of the PyTorch PatchSampleF forward pass (power=2)."""

    def __init__(self, nc=256, init_gain=0.02, seed=0, out_dtype=jnp.float32):
        self.nc = nc
        self.init_gain = init_gain
        self.seed = seed
        self.out_dtype = out_dtype
        self.mlp_init = False
        self.mlps = {}

    def _create_mlp(self, features):
        key = jax.random.PRNGKey(self.seed)
        for i, feat in enumerate(features):
            if feat.ndim != 4:
                continue
            input_nc = feat.shape[1]
            k1, k2, key = jax.random.split(key, 3)
            # TODO(synk): only a deterministic 'normal'-style init is implemented
            # (PyTorch's default Linear init / other init_type values not ported).
            w1 = self.init_gain * jax.random.normal(k1, (input_nc, self.nc), jnp.float32)
            b1 = jnp.zeros((1, self.nc), jnp.float32)
            w2 = self.init_gain * jax.random.normal(k2, (self.nc, self.nc), jnp.float32)
            b2 = jnp.zeros((1, self.nc), jnp.float32)
            self.mlps[i] = (w1, b1, w2, b2)
        self.mlp_init = True

    def __call__(self, features, power=2):
        # TODO(synk): only power=2 (L2 norm) is implemented in the kernel (the default).
        assert power == 2
        if not self.mlp_init:
            self._create_mlp(features)
        outs = []
        for feature_id, feature in enumerate(features):
            B, C, H, W = feature.shape
            # NCHW -> (B, C, H*W): pure reshape, no transpose / no extra HBM pass.
            x = feature.reshape(B, C, H * W)
            w1, b1, w2, b2 = self.mlps[feature_id]
            y = patch_sample_mlp(x, w1, b1, w2, b2, out_dtype=self.out_dtype)
            outs.append(y.reshape(B, self.nc, H, W))
        return outs


def _reference(feature, w1, b1, w2, b2):
    B, C, H, W = feature.shape
    x = jnp.transpose(feature, (0, 2, 3, 1)).reshape(-1, C)
    h = jnp.maximum(x @ w1 + b1, 0.0)
    y = h @ w2 + b2
    norm = jnp.sqrt(jnp.sum(y ** 2, axis=1, keepdims=True))
    y = y / (norm + 1e-07)
    return y.reshape(B, H, W, -1).transpose(0, 3, 1, 2)


if __name__ == "__main__":
    key = jax.random.PRNGKey(0)
    k1, k2, k3 = jax.random.split(key, 3)
    # Small shapes: batch=2, channels=4/8, spatial=16x16; plus a non-128-multiple
    # spatial case (12x12 -> HW=144) to exercise the ragged last tile (no host pad).
    f0 = jax.random.normal(k1, (2, 4, 16, 16), jnp.float32)
    f1 = jax.random.normal(k2, (2, 8, 16, 16), jnp.float32)
    f2 = jax.random.normal(k3, (1, 4, 12, 12), jnp.float32)
    feats = [f0, f1, f2]

    model = PatchSampleF(nc=32)
    outs = model(feats, power=2)
    outs = [jax.block_until_ready(o) for o in outs]

    # Correctness vs pure-JAX reference (tolerance 2e-3 covers the fused rsqrt
    # epilogue and default-precision MXU accumulation).
    for feat, out, params in zip(feats, outs, model.mlps.values()):
        ref = _reference(feat, *params)
        assert out.shape == (feat.shape[0], 32, feat.shape[2], feat.shape[3])
        assert jnp.allclose(out, ref, atol=2e-3, rtol=2e-3), "f32 path mismatch"

    # bf16-output path (halves store traffic; recommended on v5e) — looser check.
    model_bf16 = PatchSampleF(nc=32, out_dtype=jnp.bfloat16)
    out_bf16 = jax.block_until_ready(model_bf16([f0], power=2)[0])
    ref0 = _reference(f0, *model_bf16.mlps[0])
    assert out_bf16.dtype == jnp.bfloat16
    assert jnp.allclose(out_bf16.astype(jnp.float32), ref0, atol=1e-2, rtol=1e-2), \
        "bf16 path mismatch"

    print("KERNEL_OK")
</pallas_src>

<mosaic_0001>
module attributes {stable_mosaic.version = 11 : i64} {
  func.func @_patch_sample_kernel(%arg0: i32, %arg1: i32, %arg2: memref<1x4x256xf32, #tpu.memory_space<vmem>>, %arg3: memref<32x4xf32, #tpu.memory_space<vmem>>, %arg4: memref<32x1xf32, #tpu.memory_space<vmem>>, %arg5: memref<32x32xf32, #tpu.memory_space<vmem>>, %arg6: memref<32x1xf32, #tpu.memory_space<vmem>>, %arg7: memref<1x32x256xf32, #tpu.memory_space<vmem>>) attributes {dimension_semantics = [#tpu.dimension_semantics<parallel>, #tpu.dimension_semantics<parallel>], iteration_bounds = array<i64: 2, 1>, scalar_prefetch = 0 : i64, scratch_operands = 0 : i64, tpu.core_type = #tpu.core_type<tc>, window_params = [{transform_indices = @transform_0, window_bounds = array<i64: 1, 4, 256>}, {pipeline_mode = #tpu.pipeline_mode<synchronous>, transform_indices = @transform_1, window_bounds = array<i64: 32, 4>}, {pipeline_mode = #tpu.pipeline_mode<synchronous>, transform_indices = @transform_2, window_bounds = array<i64: 32, 1>}, {pipeline_mode = #tpu.pipeline_mode<synchronous>, transform_indices = @transform_3, window_bounds = array<i64: 32, 32>}, {pipeline_mode = #tpu.pipeline_mode<synchronous>, transform_indices = @transform_4, window_bounds = array<i64: 32, 1>}, {transform_indices = @transform_5, window_bounds = array<i64: 1, 32, 256>}]} {
    %c0 = arith.constant 0 : index
    %c0_0 = arith.constant 0 : index
    %c0_1 = arith.constant 0 : index
    %0 = vector.load %arg2[%c0, %c0_0, %c0_1] : memref<1x4x256xf32, #tpu.memory_space<vmem>>, vector<1x4x256xf32>
    %1 = vector.shape_cast %0 : vector<1x4x256xf32> to vector<4x256xf32>
    %c0_2 = arith.constant 0 : index
    %c0_3 = arith.constant 0 : index
    %2 = vector.load %arg3[%c0_2, %c0_3] : memref<32x4xf32, #tpu.memory_space<vmem>>, vector<32x4xf32>
    %cst = arith.constant dense<0.000000e+00> : vector<32x256xf32>
    %3 = tpu.matmul %2, %1, %cst {dimension_numbers = #tpu.dot_dimension_numbers<[1], [0], [0], [1], [0, 0, 1, 1], [], []>} : vector<32x4xf32>, vector<4x256xf32>, vector<32x256xf32> -> vector<32x256xf32>
    %c0_4 = arith.constant 0 : index
    %c0_5 = arith.constant 0 : index
    %4 = vector.load %arg4[%c0_4, %c0_5] : memref<32x1xf32, #tpu.memory_space<vmem>>, vector<32x1xf32>
    %5 = vector.broadcast %4 : vector<32x1xf32> to vector<32x256xf32>
    %6 = arith.addf %3, %5 : vector<32x256xf32>
    %cst_6 = arith.constant 0.000000e+00 : f32
    %7 = vector.broadcast %cst_6 : f32 to vector<32x256xf32>
    %8 = arith.maximumf %6, %7 : vector<32x256xf32>
    %c0_7 = arith.constant 0 : index
    %c0_8 = arith.constant 0 : index
    %9 = vector.load %arg5[%c0_7, %c0_8] : memref<32x32xf32, #tpu.memory_space<vmem>>, vector<32x32xf32>
    %cst_9 = arith.constant dense<0.000000e+00> : vector<32x256xf32>
    %10 = tpu.matmul %9, %8, %cst_9 {dimension_numbers = #tpu.dot_dimension_numbers<[1], [0], [0], [1], [0, 0, 1, 1], [], []>} : vector<32x32xf32>, vector<32x256xf32>, vector<32x256xf32> -> vector<32x256xf32>
    %c0_10 = arith.constant 0 : index
    %c0_11 = arith.constant 0 : index
    %11 = vector.load %arg6[%c0_10, %c0_11] : memref<32x1xf32, #tpu.memory_space<vmem>>, vector<32x1xf32>
    %12 = vector.broadcast %11 : vector<32x1xf32> to vector<32x256xf32>
    %13 = arith.addf %10, %12 : vector<32x256xf32>
    %14 = arith.mulf %13, %13 : vector<32x256xf32>
    %cst_12 = arith.constant dense<0.000000e+00> : vector<256xf32>
    %15 = vector.multi_reduction <add>, %14, %cst_12 [0] : vector<32x256xf32> to vector<256xf32>
    %16 = vector.shape_cast %15 : vector<256xf32> to vector<1x256xf32>
    %cst_13 = arith.constant 9.99999982E-15 : f32
    %17 = vector.broadcast %cst_13 : f32 to vector<1x256xf32>
    %18 = arith.addf %16, %17 : vector<1x256xf32>
    %19 = math.rsqrt %18 : vector<1x256xf32>
    %20 = vector.broadcast %19 : vector<1x256xf32> to vector<32x256xf32>
    %21 = arith.mulf %13, %20 : vector<32x256xf32>
    %c0_14 = arith.constant 0 : index
    %c0_15 = arith.constant 0 : index
    %c0_16 = arith.constant 0 : index
    %22 = vector.load %arg7[%c0_14, %c0_15, %c0_16] : memref<1x32x256xf32, #tpu.memory_space<vmem>>, vector<1x32x256xf32>
    %23 = vector.shape_cast %22 : vector<1x32x256xf32> to vector<32x256xf32>
    %24 = vector.shape_cast %21 : vector<32x256xf32> to vector<1x32x256xf32>
    tpu.vector_store %arg7[%c0_14, %c0_15, %c0_16], %24 {strides = array<i32>} : memref<1x32x256xf32, #tpu.memory_space<vmem>>, vector<1x32x256xf32>,
    return
  }
  func.func @transform_0(%arg0: i32, %arg1: i32) -> (i32, i32, i32) {
    %c0_i32 = arith.constant 0 : i32
    %c0_i32_0 = arith.constant 0 : i32
    return %arg0, %c0_i32, %arg1 : i32, i32, i32
  }
  func.func @transform_1(%arg0: i32, %arg1: i32) -> (i32, i32) {
    %c0_i32 = arith.constant 0 : i32
    %c0_i32_0 = arith.constant 0 : i32
    %c0_i32_1 = arith.constant 0 : i32
    return %c0_i32, %c0_i32_0 : i32, i32
  }
  func.func @transform_2(%arg0: i32, %arg1: i32) -> (i32, i32) {
    %c0_i32 = arith.constant 0 : i32
    %c0_i32_0 = arith.constant 0 : i32
    %c0_i32_1 = arith.constant 0 : i32
    return %c0_i32, %c0_i32_0 : i32, i32
  }
  func.func @transform_3(%arg0: i32, %arg1: i32) -> (i32, i32) {
    %c0_i32 = arith.constant 0 : i32
    %c0_i32_0 = arith.constant 0 : i32
    %c0_i32_1 = arith.constant 0 : i32
    return %c0_i32, %c0_i32_0 : i32, i32
  }
  func.func @transform_4(%arg0: i32, %arg1: i32) -> (i32, i32) {
    %c0_i32 = arith.constant 0 : i32
    %c0_i32_0 = arith.constant 0 : i32
    %c0_i32_1 = arith.constant 0 : i32
    return %c0_i32, %c0_i32_0 : i32, i32
  }
  func.func @transform_5(%arg0: i32, %arg1: i32) -> (i32, i32, i32) {
    %c0_i32 = arith.constant 0 : i32
    %c0_i32_0 = arith.constant 0 : i32
    return %arg0, %c0_i32, %arg1 : i32, i32, i32
  }
}

</mosaic_0001>

<bundles_post_ra>
// kernel: tpu_custom_call.1
= control target key start
LH: loop header
LB: loop body
LE: loop exit
PB: predicated region body
PF: predicated region fallthrough
CT: control target
= control target key end

     0   :  { %10 = vsyncpa [#allocation3], 0  ;;  %s1060_s0 = inlined_call_operand.vmem [shape: f32[2,4,256], index: 0, kind: input, shape index: {}]   ;;  %s1061_s1 = inlined_call_operand.vmem [shape: f32[32,4], index: 1, kind: input, shape index: {}]   ;;  %s1062_s2 = inlined_call_operand.vmem [shape: f32[32,1], index: 2, kind: input, shape index: {}]   ;;  %s1063_s3 = inlined_call_operand.vmem [shape: f32[32,32], index: 3, kind: input, shape index: {}]   ;;  %s1064_s4 = inlined_call_operand.vmem [shape: f32[32,1], index: 4, kind: input, shape index: {}]   ;;  %s1065_s5 = inlined_call_operand.hbm [shape: f32[2,32,256], index: 5, kind: output, shape index: {}]  }
   0x1   :  { %12 = vsyncpa [#allocation3 + $0x1], 0  ;;  %s885_s18 = smov 0   ;;  %s887_s19 = smov 0  }
   0x2   :  { %s889_s20 = smov 0   ;;  %s891_s21 = smov 0  }
   0x3   :  { %s893_s22 = smov 0   ;;  %s895_s23 = smov 0  }
   0x4 LB: > { %s671_s24 = sadd.s32 4294967295, %s848_s23   ;;  %s672_s25 = sadd.s32 4294967294, %s848_s23   ;;  %s848_s23 = sphi %s895_s23, %s18_s23   ;;  %s844_s22 = sphi %s893_s22, %s1072_s22   ;;  %s840_s21 = sphi %s891_s21, %s1071_s21   ;;  %s836_s20 = sphi %s889_s20, %s1070_s20   ;;  %s832_s19 = sphi %s887_s19, %s1069_s19   ;;  %s828_s18 = sphi %s885_s18, %s1068_s18  }
   0x5   : > { %s30_s26 = sadd.s32 1, %s844_s22  ;;  %s151_s27 = sadd.s32 1, %s836_s20 }
   0x6   : > { %p32_p0 = scmp.ge.s32.totalorder %s30_s26, 2  ;;  %p161_p1 = scmp.ne.s32.totalorder %s836_s20, %s832_s19 }
   0x7   : > { %p162_p2 = scmp.eq.s32.totalorder %s671_s24, 1  ;;  %p167_p3 = scmp.ne.s32.totalorder %s832_s19, %s828_s18 }
   0x8   : > { %s1074_s26 = smov (%p32_p0, %s30_s26), 0  ;;  %p168_p5 = scmp.eq.s32.totalorder %s672_s25, 1 }
   0x9   : > { %p925_p4 = por %p162_p2, %p161_p1  ;;  %s146_s29 = ssub.s32 %s844_s22, %s1074_s26 }
   0xa   : > { %p675_p6 = scmp.ge.s32.totalorder %s848_s23, 1  ;;  %p149_p7 = scmp.eq.s32.totalorder %s146_s29, 0 }
   0xb   : > { %p932_p8 = por %p168_p5, %p167_p3  ;;  %p211_p9 = scmp.lt.s32.totalorder %s848_s23, 3 }
   0xc   : > { %s938_s6 = scalar_select %p149_p7, %s836_s20, %s151_s27  }
   0xd   : > { %p212_p10 = pnand %p675_p6, %p211_p9 }
   0xe   : > { %p244_p11 = scmp.lt.s32.totalorder (!%p212_p10), %s840_s21, 1  ;;  %v850_v0 = vmov (!%p212_p10), 0.0   ;;  %v259_v1 = vld [vmem:[%s1062_s2] sm:$0xff] (!%p212_p10)  ;;  %v851_v2 = vmov (!%p212_p10), 0   ;;  %v261_v3 = vld [vmem:[%s1062_s2 + $0x10] sm:$0xff] (!%p212_p10)  ;;  %v260_v4 = vld [vmem:[%s1062_s2 + $0x8] sm:$0xff] (!%p212_p10) }
   0xf   : > { %215 = sbr.rel (%p212_p10) target bundleno = 541 (0x21d), region = 40  ;;  %367 = vmatprep.mubr.f32.mxu0 (!%p212_p10), %v850_v0  ;;  %505 = vmatprep.mubr.f32.mxu1 (!%p212_p10), %v850_v0  ;;  %v262_v5 = vld [vmem:[%s1062_s2 + $0x18] sm:$0xff] (!%p212_p10)  ;;  %vm298_vm0 = vcmask (!%p212_p10), 1043456   ;;  %v255_v8 = vld [vmem:[%s1061_s1] sm:$0xff] (!%p212_p10)  ;;  %vm285_vm1 = vcmask (!%p212_p10), 31744   ;;  %v405_v10 = vld [vmem:[%s1064_s4 + $0x8] sm:$0xff] (!%p212_p10) }
  0x10   : > { %763 = vset.pattern.permute.xlu0 (!%p212_p10), %v851_v2  ;;  %764 = vset.pattern.permute.xlu1 (!%p212_p10), %v851_v2  ;;  %v404_v9 = vld [vmem:[%s1064_s4] sm:$0xff] (!%p212_p10)  ;;  %v256_v11 = vld [vmem:[%s1061_s1 + $0x8] sm:$0xff] (!%p212_p10)  ;;  %v406_v12 = vld [vmem:[%s1064_s4 + $0x10] sm:$0xff] (!%p212_p10)  ;;  %vm428_vm2 = vcmask (!%p212_p10), 261120   ;;  %s240_s14 = sand.u32 (!%p212_p10), 1, %s832_s19   ;;  %s695_s16 = sshll.u32 (!%p212_p10), %s840_s21, 10 }
  0x11   : > { %265 = vperm.xlu0 (!%p212_p10), %763, %v259_v1   ;;  %275 = vperm.xlu1 (!%p212_p10), %764, %v261_v3   ;;  %v407_v13 = vld [vmem:[%s1064_s4 + $0x18] sm:$0xff] (!%p212_p10)  ;;  %v257_v14 = vld [vmem:[%s1061_s1 + $0x10] sm:$0xff] (!%p212_p10)  ;;  %v400_v48 = vld [vmem:[%s1063_s3] sm:$0xff] (!%p212_p10)  ;;  %s676_s15 = sshll.u32 (!%p212_p10), %s240_s14, 6  ;;  %s1010_s29 = scalar_lea.hbm (!%p212_p10), %s1065_s5, %s695_s16 }
  0x12   : > { %v258_v15 = vld [vmem:[%s1061_s1 + $0x18] sm:$0xff] (!%p212_p10)  ;;  %v401_v49 = vld [vmem:[%s1063_s3 + $0x8] sm:$0xff] (!%p212_p10)  ;;  %v402_v50 = vld [vmem:[%s1063_s3 + $0x10] sm:$0xff] (!%p212_p10)  ;;  %s242_s17 = scalar_lea.vmem (!%p212_p10), [#allocation2], %s676_s15  ;;  %s852_s8 = smov (!%p212_p10), [#allocation2]  }
  0x13   : > { %v403_v51 = vld [vmem:[%s1063_s3 + $0x18] sm:$0xff] (!%p212_p10)  ;;  %s592_s24 = sshll.u32 (!%p212_p10), %s242_s17, 4  ;;  %s1012_s24 = int_to_ptr.vmem [resolvable:$true] %s592_s24 }
  0x14   : > { %s770_s7 = scalar_lea.vmem (!%p212_p10), %s1012_s24, 1024 }
  0x15   : > { %270 = vperm.xlu0 (!%p212_p10), %763, %v260_v4   ;;  %280 = vperm.xlu1 (!%p212_p10), %764, %v262_v5   ;;  %p771_p12 = scmp.ne.s32.totalorder (!%p212_p10), %s1012_s24, %s770_s7 }
  0x16   : > { %s245_s9 = scalar_select %p244_p11, %s840_s21, 1 }
  0x17   : > { %s1014_s21 = scalar_lea.sflag [#allocation3], %s240_s14  ;;  %p772_p13 = pnand %p771_p12, %p925_p4 }
  0x18   : > { %s694_s12 = sshll.u32 %s245_s9, 3  ;;  %s774_s9 = sshll.u32 %s852_s8, 4  ;;  %s775_s9 = int_to_ptr.vmem [resolvable:$false] %s774_s9 }
  0x19   : > { %s251_s25 = scalar_lea.vmem %s1060_s0, %s694_s12  ;;  %410 = vperm.xlu0 %763, %v404_v9   ;;  %415 = vperm.xlu1 %764, %v405_v10   ;;  %p773_p0 = pneg %p772_p13 }
  0x1a   : > { %v254_v6 = vld [vmem:[%s251_s25] sm:$0xff]  ;;  %s776_s10 = scalar_lea.vmem %s775_s9, 2048  ;;  %p777_p1 = scmp.lt.s32.totalorder %s1012_s24, %s775_s9 }
  0x1b   : > { %v284_v7 = vcombine.high %v254_v6, %v254_v6  ;;  %p778_p2 = scmp.lt.s32.totalorder %s776_s10, %s770_s7 }
  0x1d   : > { %679 = vmatprep.subr.msk.mxu0 %vm298_vm0, %v284_v7  ;;  %420 = vperm.xlu0 %763, %v406_v12   ;;  %p779_p3 = por %p778_p2, %p777_p1 }
  0x1e   : > { %680 = vmatpush1.msk.msra.mxu0 %vm298_vm0, %v254_v6  ;;  %425 = vperm.xlu1 %764, %v407_v13  }
  0x1f   : > { %681 = vmatmul.mubr.msk.f32.vlgmr.msra.gmra.mrb[0].mxu0 %vm285_vm1, %v255_v8  ;;  %p780_p5 = pnand %p779_p3, %p773_p0 }
  0x20   : > { %373 = vmatprep.mubr.f32.mxu0 %v850_v0 }
  0x23   : > { %682 = vmatmul.mubr.msk.f32.gmra.mrb[2].mxu0 %vm285_vm1, %v256_v11 }
  0x24   : > { %379 = vmatprep.mubr.f32.mxu0 %v850_v0 }
  0x27   : > { %683 = vmatmul.mubr.msk.f32.gmra.mrb[4].mxu0 %vm285_vm1, %v257_v14 }
  0x28   : > { %385 = vmatprep.mubr.f32.mxu0 %v850_v0 }
  0x2b   : > { %684 = vmatmul.mubr.msk.f32.gmra.mrb[6].mxu0 %vm285_vm1, %v258_v15 }
  0x90   : > { %v266_v16 = vpop.permute.xlu0 %265  ;;  %v276_v25 = vpop.permute.xlu1 %275 }
  0x94   : > { %v271_v20 = vpop.permute.xlu0 %270  ;;  %v281_v36 = vpop.permute.xlu1 %280 }
  0x98   : > { %v411_v54 = vpop.permute.xlu0 %410  ;;  %v416_v56 = vpop.permute.xlu1 %415 }
  0x9c   : > { %v421_v1 = vpop.permute.xlu0 %420 }
  0x9d   : > { %v426_v10 = vpop.permute.xlu1 %425 }
  0xf2   : > { %v369_v17 = vpop.f32.mrb[0].mxu0 }
  0xf3   : > { %v371_v18 = vpop.f32.mrb[1].mxu0  ;;  %v370_v19 = vadd.f32 %v369_v17, %v266_v16 }
  0xf4   : > { %v372_v21 = vadd.f32 %v371_v18, %v266_v16 }
  0xf5   : > { %v392_v27 = vmax.f32 %v370_v19, 0.0 }
  0xf6   : > { %v375_v22 = vpop.f32.mrb[2].mxu0  ;;  %v393_v29 = vmax.f32 %v372_v21, 0.0 }
  0xf7   : > { %v376_v23 = vadd.f32 %v375_v22, %v271_v20  ;;  %v377_v24 = vpop.f32.mrb[3].mxu0 }
  0xf8   : > { %v378_v26 = vadd.f32 %v377_v24, %v271_v20 }
  0xf9   : > { %v394_v28 = vmax.f32 %v376_v23, 0.0 }
  0xfa   : > { %v395_v30 = vmax.f32 %v378_v26, 0.0  ;;  %v381_v31 = vpop.f32.mrb[4].mxu0 }
  0xfb   : > { %v383_v32 = vpop.f32.mrb[5].mxu0  ;;  %v698_v33 = vpack.c.bf16 %v394_v28, %v392_v27  ;;  %v382_v35 = vadd.f32 %v381_v31, %v276_v25 }
  0xfc   : > { %v696_v34 = vpack.c.bf16 %v395_v30, %v393_v29  ;;  %v384_v37 = vadd.f32 %v383_v32, %v276_v25 }
  0xfd   : > { %v396_v42 = vmax.f32 %v382_v35, 0.0 }
  0xfe   : > { %v387_v38 = vpop.f32.mrb[6].mxu0  ;;  %697 = vmatprep.subr.bf16.mxu1 %v696_v34  ;;  %v397_v44 = vmax.f32 %v384_v37, 0.0 }
  0xff   : > { %v388_v39 = vadd.f32 %v387_v38, %v281_v36  ;;  %v389_v40 = vpop.f32.mrb[7].mxu0  ;;  %699 = vmatpush1.bf16.msra.mxu1 %v698_v33 }
 0x100   : > { %v390_v41 = vadd.f32 %v389_v40, %v281_v36 }
 0x101   : > { %v398_v43 = vmax.f32 %v388_v39, 0.0 }
 0x102   : > { %v399_v45 = vmax.f32 %v390_v41, 0.0 }
 0x103   : > { %v702_v46 = vpack.c.bf16 %v398_v43, %v396_v42 }
 0x104   : > { %v700_v47 = vpack.c.bf16 %v399_v45, %v397_v44 }
 0x106   : > { %701 = vmatprep.subr.bf16.mxu1 %v700_v47 }
 0x107   : > { %703 = vmatpush1.bf16.msra.mxu1 %v702_v46 }
 0x10a   : > { %685 = vmatmul.mubr.msk.f32.vlgmr.msra.gmra.mrb[0].mxu1 %vm428_vm2, %v400_v48 }
 0x10b   : > { %511 = vmatprep.mubr.f32.mxu1 %v850_v0 }
 0x10e   : > { %686 = vmatmul.mubr.msk.f32.gmra.mrb[2].mxu1 %vm428_vm2, %v401_v49 }
 0x10f   : > { %517 = vmatprep.mubr.f32.mxu1 %v850_v0 }
 0x112   : > { %687 = vmatmul.mubr.msk.f32.gmra.mrb[4].mxu1 %vm428_vm2, %v402_v50 }
 0x113   : > { %523 = vmatprep.mubr.f32.mxu1 %v850_v0 }
 0x116   : > { %688 = vmatmul.mubr.msk.f32.gmra.mrb[6].mxu1 %vm428_vm2, %v403_v51 }
 0x1dd   : > { %v507_v52 = vpop.f32.mrb[0].mxu1 }
 0x1de   : > { %v509_v53 = vpop.f32.mrb[1].mxu1  ;;  %v508_v55 = vadd.f32 %v507_v52, %v411_v54 }
 0x1df   : > { %v510_v57 = vadd.f32 %v509_v53, %v411_v54 }
 0x1e0   : > { %v530_v62 = vmul.f32 %v508_v55, %v508_v55 }
 0x1e1   : > { %v513_v58 = vpop.f32.mrb[2].mxu1  ;;  %v531_v2 = vmul.f32 %v510_v57, %v510_v57 }
 0x1e2   : > { %v514_v59 = vadd.f32 %v513_v58, %v416_v56  ;;  %v515_v60 = vpop.f32.mrb[3].mxu1 }
 0x1e3   : > { %v516_v61 = vadd.f32 %v515_v60, %v416_v56 }
 0x1e4   : > { %v532_v63 = vmul.f32 %v514_v59, %v514_v59 }
 0x1e5   : > { %v533_v0 = vmul.f32 %v516_v61, %v516_v61  ;;  %v519_v3 = vpop.f32.mrb[4].mxu1 }
 0x1e6   : > { %v538_v4 = vadd.f32 %v532_v63, %v530_v62  ;;  %v520_v5 = vadd.f32 %v519_v3, %v421_v1  ;;  %v521_v6 = vpop.f32.mrb[5].mxu1 }
 0x1e7   : > { %v547_v7 = vadd.f32 %v533_v0, %v531_v2  ;;  %v522_v8 = vadd.f32 %v521_v6, %v421_v1 }
 0x1e8   : > { %v534_v9 = vmul.f32 %v520_v5, %v520_v5 }
 0x1e9   : > { %v535_v11 = vmul.f32 %v522_v8, %v522_v8  ;;  %v525_v12 = vpop.f32.mrb[6].mxu1 }
 0x1ea   : > { %v539_v13 = vadd.f32 %v538_v4, %v534_v9  ;;  %v526_v14 = vadd.f32 %v525_v12, %v426_v10  ;;  %v527_v15 = vpop.f32.mrb[7].mxu1 }
 0x1eb   : > { %v548_v16 = vadd.f32 %v547_v7, %v535_v11  ;;  %v528_v17 = vadd.f32 %v527_v15, %v426_v10 }
 0x1ec   : > { %v536_v18 = vmul.f32 %v526_v14, %v526_v14 }
 0x1ed   : > { %v537_v19 = vmul.f32 %v528_v17, %v528_v17 }
 0x1ee   : > { %v540_v20 = vadd.f32 %v539_v13, %v536_v18 }
 0x1ef   : > { %v549_v21 = vadd.f32 %v548_v16, %v537_v19 }
 0x1f0   : > { %v541_v22 = vrot.slane %v540_v20, 4 }
 0x1f1   : > { %v550_v23 = vrot.slane %v549_v21, 4 }
 0x1f2   : > { %v542_v24 = vadd.f32 %v541_v22, %v540_v20 }
 0x1f3   : > { %v551_v25 = vadd.f32 %v550_v23, %v549_v21 }
 0x1f4   : > { %v543_v26 = vrot.slane %v542_v24, 2 }
 0x1f5   : > { %v552_v27 = vrot.slane %v551_v25, 2 }
 0x1f6   : > { %v544_v28 = vadd.f32 %v543_v26, %v542_v24 }
 0x1f7   : > { %v553_v29 = vadd.f32 %v552_v27, %v551_v25 }
 0x1f8   : > { %v545_v30 = vrot.slane %v544_v28, 1 }
 0x1f9   : > { %v554_v31 = vrot.slane %v553_v29, 1 }
 0x1fa   : > { %v546_v32 = vadd.f32 %v545_v30, %v544_v28 }
 0x1fb   : > { %v555_v33 = vadd.f32 %v554_v31, %v553_v29 }
 0x1fc   : > { %v556_v34 = vadd.f32 1e-14, %v546_v32 }
 0x1fd   : > { %v557_v35 = vadd.f32 1e-14, %v555_v33 }
 0x1fe   : > { %766 = vrsqrt.f32 %v556_v34 }
 0x1ff   : > { %768 = vrsqrt.f32 %v557_v35 }
 0x208   : > { %v767_v36 = vpop.eup %766 }
 0x209   : > { %v769_v37 = vpop.eup %768  ;;  %v566_v38 = vmul.f32 %v767_v36, %v526_v14  ;;  %v560_v39 = vmul.f32 %v767_v36, %v508_v55  ;;  %v562_v40 = vmul.f32 %v767_v36, %v514_v59  ;;  %v564_v41 = vmul.f32 %v767_v36, %v520_v5 }
 0x20a   : > { %v567_v42 = vmul.f32 %v769_v37, %v528_v17  ;;  %v561_v43 = vmul.f32 %v769_v37, %v510_v57  ;;  %v563_v44 = vmul.f32 %v769_v37, %v516_v61  ;;  %v565_v45 = vmul.f32 %v769_v37, %v522_v8 }
 0x20b   : > { %574 = vst [vmem:[%s242_s17 + $0x30] sm:$0xff] %v566_v38  ;;  %568 = vst [vmem:[%s242_s17] sm:$0xff] %v560_v39 }
 0x20c   : > { %570 = vst [vmem:[%s242_s17 + $0x10] sm:$0xff] %v562_v40  ;;  %572 = vst [vmem:[%s242_s17 + $0x20] sm:$0xff] %v564_v41 }
 0x20d   : > { %575 = vst [vmem:[%s242_s17 + $0x38] sm:$0xff] %v567_v42  ;;  %569 = vst [vmem:[%s242_s17 + $0x8] sm:$0xff] %v561_v43 }
 0x20e   : > { %571 = vst [vmem:[%s242_s17 + $0x18] sm:$0xff] %v563_v44  ;;  %573 = vst [vmem:[%s242_s17 + $0x28] sm:$0xff] %v565_v45 }
 0x20f   : > { %783 = shalt.err (!%p780_p5)
}
 0x210   : > { %s784_s11 = scalar_lea.hbm %s1010_s29, 1024  ;;  %s788_s14 = scalar_lea.hbm %s1065_s5, 2048 }
 0x211   : > { %p785_p6 = scmp.ne.s32.totalorder %s1010_s29, %s784_s11  ;;  %p789_p10 = scmp.lt.u32.totalorder %s1010_s29, %s1065_s5 }
 0x212   : > { %p790_p11 = scmp.lt.u32.totalorder %s788_s14, %s784_s11  ;;  %p792_p13 = scmp.lt.u32.totalorder %s784_s11, %s1010_s29 }
 0x213   : > { %p786_p7 = pnand %p785_p6, %p925_p4 }
 0x214   : > { %p791_p12 = por %p790_p11, %p789_p10 }
 0x215   : > { %p787_p9 = pneg %p786_p7 }
 0x216   : > { %p793_p0 = por %p792_p13, %p791_p12 }
 0x218   : > { %p794_p1 = pnand %p793_p0, %p787_p9 }
 0x21a   : > { %797 = shalt.err (!%p794_p1)
}
 0x21b   : > { %s853_s17 = smov 256   ;;  %s854_s25 = smov 16  }
 0x21c   : > { %704 = dma.vmem_to_hbm [thread:$0]  (%p925_p4), %s1012_s24, 1024, %s1010_s29, %s1014_s21, %s853_s17, %s853_s17, %s854_s25  }
 0x21d PF: > { %p710_p2 = scmp.ge.s32.totalorder %s848_s23, 2  ;;  %s607_s27 = sand.u32 1, %s828_s18  }
 0x21e   : > { %s608_s7 = scalar_lea.sflag [#allocation3], %s607_s27 }
 0x21f   : > { %p707_p3 = pnand %p710_p2, %p932_p8 }
 0x221   : > { %823 = dma.done.wait (!%p707_p3), %s608_s7, 1024  }
 0x222   : > { %825 = vsyncadd (!%p707_p3), %s608_s7, 4294966272  ;;  %s18_s23 = sadd.s32 1, %s848_s23   ;;  %s1068_s18 = smov %s832_s19 }
 0x223   : > { %p15_p5 = scmp.ge.s32.totalorder %s18_s23, 4   ;;  %s1069_s19 = smov %s836_s20 }
 0x224   : > { %s1070_s20 = smov %s938_s6  ;;  %s1071_s21 = smov %s844_s22 }
 0x225   : > { %s1072_s22 = smov %s1074_s26  ;;  %17 = sbr.rel (!%p15_p5) target bundleno = 4 (0x4), region = 75 }
 0x22c   :  { %613 = vsyncpa [#allocation3], 1 }
 0x22d   :  { %615 = vsyncpa [#allocation3 + $0x1], 1 }

</bundles_post_ra>
